<compile_context>
chip_gen: v7x
topology: tpu7x:2x2x1
jax: 0.10.0
libtpu: 0.0.40
codegen_flags: <defaults>
</compile_context>

<pallas_src>
import math

import jax
import jax.numpy as jnp
from jax.experimental import pallas as pl
from jax.experimental.pallas import tpu as pltpu

_HIGHEST = jax.lax.Precision.HIGHEST


def mlp_kernel(x_ref, w1_ref, b1_ref, w2_ref, b2_ref, w3_ref, b3_ref, o_ref):
    # x_ref: (F, TN) feature-major batch slab (batch along the 128-lane axis).
    # Weights are PyTorch-layout [out, in]; biases are (out, 1), broadcast over
    # lanes.  All three GEMMs run on the MXU; at these tiny K/N they are
    # negligible next to the HBM stream.
    x = x_ref[...]

    # hidden1: Linear(input_f, 10) + ReLU
    h1 = jnp.dot(w1_ref[...], x, preferred_element_type=jnp.float32,
                 precision=_HIGHEST) + b1_ref[...]
    h1 = jnp.maximum(h1, 0.0)

    # hidden2: Linear(10, 8) + ReLU
    h2 = jnp.dot(w2_ref[...], h1, preferred_element_type=jnp.float32,
                 precision=_HIGHEST) + b2_ref[...]
    h2 = jnp.maximum(h2, 0.0)

    # hidden3: Linear(8, 3), no activation (logits)
    h3 = jnp.dot(w3_ref[...], h2, preferred_element_type=jnp.float32,
                 precision=_HIGHEST) + b3_ref[...]

    o_ref[...] = h3.astype(o_ref.dtype)


def mlp_forward_fmajor(x_fm, params, *, tn=32768):
    """Fast path: x_fm is feature-major [F, B] f32; returns logits as [3, B].

    params are PyTorch-style [out, in] weights and (out, 1) biases.
    """
    w1, b1, w2, b2, w3, b3 = params
    F, B = x_fm.shape

    # Lane-dense batch tile: multiple of 128 unless it covers the whole batch.
    tn = min(tn, B)
    if tn < B:
        tn = max(128, (tn // 128) * 128)
    n_blocks = pl.cdiv(B, tn)

    # v7x has 2 TensorCores: for non-trivial batches make sure there are at
    # least 2 "parallel" grid steps so a giant tile doesn't idle one core.
    if n_blocks == 1 and B >= 256:
        tn = ((pl.cdiv(B, 2) + 127) // 128) * 128
        n_blocks = pl.cdiv(B, tn)

    # Per-step VMEM: double-buffered X/out blocks + h1/h2/h3 intermediates
    # ~= (2F + 2*3 + 21) * 4 bytes per batch column.  Raise the scoped limit
    # for large tiles; clamp so we never ask for silly amounts.
    per_col_bytes = 4 * (2 * F + 2 * 3 + 10 + 8 + 3)
    vmem_limit = max(32 << 20,
                     min(int(1.5 * per_col_bytes * tn) + (1 << 20), 96 << 20))

    n_param = w1.size + b1.size + w2.size + b2.size + w3.size + b3.size
    cost = pl.CostEstimate(
        flops=2 * B * (F * 10 + 10 * 8 + 8 * 3),
        transcendentals=0,
        bytes_accessed=4 * (B * (F + 3) + n_param),
    )

    resident = lambda a: pl.BlockSpec(a.shape, lambda i: (0,) * a.ndim)

    out = pl.pallas_call(
        mlp_kernel,
        out_shape=jax.ShapeDtypeStruct((3, B), jnp.float32),
        grid=(n_blocks,),
        in_specs=[
            pl.BlockSpec((F, tn), lambda i: (0, i)),   # X streams lane-dense
            resident(w1), resident(b1),                # params stay VMEM-resident
            resident(w2), resident(b2),
            resident(w3), resident(b3),
        ],
        out_specs=pl.BlockSpec((3, tn), lambda i: (0, i)),
        compiler_params=pltpu.CompilerParams(
            dimension_semantics=("parallel",),
            vmem_limit_bytes=vmem_limit,
        ),
        cost_estimate=cost,
    )(x_fm, w1, b1, w2, b2, w3, b3)

    return out


def mlp_forward(x, params, *, tn=32768):
    """PyTorch-compatible entry point: x is [B, F]; returns logits [B, 3].

    Note: this pays one cheap XLA transpose over X to reach the lane-dense
    feature-major layout; callers that can hold X feature-major should use
    mlp_forward_fmajor directly and avoid it.
    """
    out_fm = mlp_forward_fmajor(jnp.transpose(x), params, tn=tn)
    return jnp.transpose(out_fm)


def init_params(key, input_f):
    """Deterministic init mirroring the PyTorch module's __init__ (biases as (out,1))."""
    k1, k2, k3, kb1, kb2 = jax.random.split(key, 5)

    def kaiming_uniform(k, out_f, in_f):
        # gain = sqrt(2) for relu -> bound = sqrt(6 / fan_in)
        bound = math.sqrt(6.0 / in_f)
        return jax.random.uniform(k, (out_f, in_f), jnp.float32, -bound, bound)

    def xavier_uniform(k, out_f, in_f):
        bound = math.sqrt(6.0 / (in_f + out_f))
        return jax.random.uniform(k, (out_f, in_f), jnp.float32, -bound, bound)

    def default_bias(k, out_f, in_f):
        bound = 1.0 / math.sqrt(in_f)
        return jax.random.uniform(k, (out_f, 1), jnp.float32, -bound, bound)

    w1 = kaiming_uniform(k1, 10, input_f)
    b1 = default_bias(kb1, 10, input_f)
    w2 = kaiming_uniform(k2, 8, 10)
    b2 = default_bias(kb2, 8, 10)
    w3 = xavier_uniform(k3, 3, 8)
    b3 = jnp.zeros((3, 1), jnp.float32)  # hidden3.bias.data.fill_(0)

    return (w1, b1, w2, b2, w3, b3)


def _reference(x, params):
    """Pure-JAX reference with the original (B, F) -> (B, 3) semantics."""
    w1, b1, w2, b2, w3, b3 = params
    h1 = jnp.maximum(
        jnp.dot(x, w1.T, precision=_HIGHEST) + b1.T, 0.0)
    h2 = jnp.maximum(
        jnp.dot(h1, w2.T, precision=_HIGHEST) + b2.T, 0.0)
    return jnp.dot(h2, w3.T, precision=_HIGHEST) + b3.T


if __name__ == "__main__":
    key = jax.random.PRNGKey(0)
    kx, kx2, kp = jax.random.split(key, 3)

    input_f = 4   # e.g. iris-style features
    params = init_params(kp, input_f)

    # Small batch, single grid step, batch-major convenience entry point.
    batch = 8
    x = jax.random.normal(kx, (batch, input_f), jnp.float32)
    out = mlp_forward(x, params)
    jax.block_until_ready(out)
    assert out.shape == (batch, 3)
    assert jnp.allclose(out, _reference(x, params), atol=1e-5, rtol=1e-5), \
        "mismatch vs reference"

    # Larger batch, feature-major fast path, ragged tail (no padding copy):
    # tn=128 -> grid of 3 steps with a 44-column partial last block whose
    # out-of-bounds writes Pallas drops.
    batch2 = 300
    x2_fm = jax.random.normal(kx2, (input_f, batch2), jnp.float32)
    out2_fm = mlp_forward_fmajor(x2_fm, params, tn=128)
    jax.block_until_ready(out2_fm)
    assert out2_fm.shape == (3, batch2)
    assert jnp.allclose(out2_fm.T, _reference(x2_fm.T, params),
                        atol=1e-5, rtol=1e-5), "mismatch vs reference (tiled/ragged)"

    print("KERNEL_OK")
</pallas_src>

<mosaic_0001>
module attributes {stable_mosaic.version = 11 : i64} {
  func.func @mlp_kernel(%arg0: i32, %arg1: memref<4x8xf32, #tpu.memory_space<vmem>>, %arg2: memref<10x4xf32, #tpu.memory_space<vmem>>, %arg3: memref<10x1xf32, #tpu.memory_space<vmem>>, %arg4: memref<8x10xf32, #tpu.memory_space<vmem>>, %arg5: memref<8x1xf32, #tpu.memory_space<vmem>>, %arg6: memref<3x8xf32, #tpu.memory_space<vmem>>, %arg7: memref<3x1xf32, #tpu.memory_space<vmem>>, %arg8: memref<3x8xf32, #tpu.memory_space<vmem>>) attributes {dimension_semantics = [#tpu.dimension_semantics<parallel>], iteration_bounds = array<i64: 1>, scalar_prefetch = 0 : i64, scratch_operands = 0 : i64, tpu.core_type = #tpu.core_type<tc>, window_params = [{transform_indices = @transform_0, window_bounds = array<i64: 4, 8>}, {pipeline_mode = #tpu.pipeline_mode<synchronous>, transform_indices = @transform_1, window_bounds = array<i64: 10, 4>}, {pipeline_mode = #tpu.pipeline_mode<synchronous>, transform_indices = @transform_2, window_bounds = array<i64: 10, 1>}, {pipeline_mode = #tpu.pipeline_mode<synchronous>, transform_indices = @transform_3, window_bounds = array<i64: 8, 10>}, {pipeline_mode = #tpu.pipeline_mode<synchronous>, transform_indices = @transform_4, window_bounds = array<i64: 8, 1>}, {pipeline_mode = #tpu.pipeline_mode<synchronous>, transform_indices = @transform_5, window_bounds = array<i64: 3, 8>}, {pipeline_mode = #tpu.pipeline_mode<synchronous>, transform_indices = @transform_6, window_bounds = array<i64: 3, 1>}, {transform_indices = @transform_7, window_bounds = array<i64: 3, 8>}]} {
    %c0 = arith.constant 0 : index
    %c0_0 = arith.constant 0 : index
    %0 = vector.load %arg1[%c0, %c0_0] : memref<4x8xf32, #tpu.memory_space<vmem>>, vector<4x8xf32>
    %c0_1 = arith.constant 0 : index
    %c0_2 = arith.constant 0 : index
    %1 = vector.load %arg2[%c0_1, %c0_2] : memref<10x4xf32, #tpu.memory_space<vmem>>, vector<10x4xf32>
    %cst = arith.constant dense<0.000000e+00> : vector<10x8xf32>
    %2 = tpu.matmul %1, %0, %cst {dimension_numbers = #tpu.dot_dimension_numbers<[1], [0], [0], [1], [0, 0, 1, 1], [], []>, precision = #tpu.contract_precision<fp32>} : vector<10x4xf32>, vector<4x8xf32>, vector<10x8xf32> -> vector<10x8xf32>
    %c0_3 = arith.constant 0 : index
    %c0_4 = arith.constant 0 : index
    %3 = vector.load %arg3[%c0_3, %c0_4] : memref<10x1xf32, #tpu.memory_space<vmem>>, vector<10x1xf32>
    %4 = vector.broadcast %3 : vector<10x1xf32> to vector<10x8xf32>
    %5 = arith.addf %2, %4 : vector<10x8xf32>
    %cst_5 = arith.constant 0.000000e+00 : f32
    %6 = vector.broadcast %cst_5 : f32 to vector<10x8xf32>
    %7 = arith.maximumf %5, %6 : vector<10x8xf32>
    %c0_6 = arith.constant 0 : index
    %c0_7 = arith.constant 0 : index
    %8 = vector.load %arg4[%c0_6, %c0_7] : memref<8x10xf32, #tpu.memory_space<vmem>>, vector<8x10xf32>
    %cst_8 = arith.constant dense<0.000000e+00> : vector<8x8xf32>
    %9 = tpu.matmul %8, %7, %cst_8 {dimension_numbers = #tpu.dot_dimension_numbers<[1], [0], [0], [1], [0, 0, 1, 1], [], []>, precision = #tpu.contract_precision<fp32>} : vector<8x10xf32>, vector<10x8xf32>, vector<8x8xf32> -> vector<8x8xf32>
    %c0_9 = arith.constant 0 : index
    %c0_10 = arith.constant 0 : index
    %10 = vector.load %arg5[%c0_9, %c0_10] : memref<8x1xf32, #tpu.memory_space<vmem>>, vector<8x1xf32>
    %11 = vector.broadcast %10 : vector<8x1xf32> to vector<8x8xf32>
    %12 = arith.addf %9, %11 : vector<8x8xf32>
    %cst_11 = arith.constant 0.000000e+00 : f32
    %13 = vector.broadcast %cst_11 : f32 to vector<8x8xf32>
    %14 = arith.maximumf %12, %13 : vector<8x8xf32>
    %c0_12 = arith.constant 0 : index
    %c0_13 = arith.constant 0 : index
    %15 = vector.load %arg6[%c0_12, %c0_13] : memref<3x8xf32, #tpu.memory_space<vmem>>, vector<3x8xf32>
    %cst_14 = arith.constant dense<0.000000e+00> : vector<3x8xf32>
    %16 = tpu.matmul %15, %14, %cst_14 {dimension_numbers = #tpu.dot_dimension_numbers<[1], [0], [0], [1], [0, 0, 1, 1], [], []>, precision = #tpu.contract_precision<fp32>} : vector<3x8xf32>, vector<8x8xf32>, vector<3x8xf32> -> vector<3x8xf32>
    %c0_15 = arith.constant 0 : index
    %c0_16 = arith.constant 0 : index
    %17 = vector.load %arg7[%c0_15, %c0_16] : memref<3x1xf32, #tpu.memory_space<vmem>>, vector<3x1xf32>
    %18 = vector.broadcast %17 : vector<3x1xf32> to vector<3x8xf32>
    %19 = arith.addf %16, %18 : vector<3x8xf32>
    %c0_17 = arith.constant 0 : index
    %c0_18 = arith.constant 0 : index
    %20 = vector.load %arg8[%c0_17, %c0_18] : memref<3x8xf32, #tpu.memory_space<vmem>>, vector<3x8xf32>
    tpu.vector_store %arg8[%c0_17, %c0_18], %19 {strides = array<i32>} : memref<3x8xf32, #tpu.memory_space<vmem>>, vector<3x8xf32>,
    return
  }
  func.func @transform_0(%arg0: i32) -> (i32, i32) {
    %c0_i32 = arith.constant 0 : i32
    %c0_i32_0 = arith.constant 0 : i32
    return %c0_i32, %arg0 : i32, i32
  }
  func.func @transform_1(%arg0: i32) -> (i32, i32) {
    %c0_i32 = arith.constant 0 : i32
    %c0_i32_0 = arith.constant 0 : i32
    %c0_i32_1 = arith.constant 0 : i32
    return %c0_i32, %c0_i32_0 : i32, i32
  }
  func.func @transform_2(%arg0: i32) -> (i32, i32) {
    %c0_i32 = arith.constant 0 : i32
    %c0_i32_0 = arith.constant 0 : i32
    %c0_i32_1 = arith.constant 0 : i32
    return %c0_i32, %c0_i32_0 : i32, i32
  }
  func.func @transform_3(%arg0: i32) -> (i32, i32) {
    %c0_i32 = arith.constant 0 : i32
    %c0_i32_0 = arith.constant 0 : i32
    %c0_i32_1 = arith.constant 0 : i32
    return %c0_i32, %c0_i32_0 : i32, i32
  }
  func.func @transform_4(%arg0: i32) -> (i32, i32) {
    %c0_i32 = arith.constant 0 : i32
    %c0_i32_0 = arith.constant 0 : i32
    %c0_i32_1 = arith.constant 0 : i32
    return %c0_i32, %c0_i32_0 : i32, i32
  }
  func.func @transform_5(%arg0: i32) -> (i32, i32) {
    %c0_i32 = arith.constant 0 : i32
    %c0_i32_0 = arith.constant 0 : i32
    %c0_i32_1 = arith.constant 0 : i32
    return %c0_i32, %c0_i32_0 : i32, i32
  }
  func.func @transform_6(%arg0: i32) -> (i32, i32) {
    %c0_i32 = arith.constant 0 : i32
    %c0_i32_0 = arith.constant 0 : i32
    %c0_i32_1 = arith.constant 0 : i32
    return %c0_i32, %c0_i32_0 : i32, i32
  }
  func.func @transform_7(%arg0: i32) -> (i32, i32) {
    %c0_i32 = arith.constant 0 : i32
    %c0_i32_0 = arith.constant 0 : i32
    return %c0_i32, %arg0 : i32, i32
  }
}

</mosaic_0001>

<bundles_post_ra>
// kernel: tpu_custom_call.1
= control target key start
LH: loop header
LB: loop body
LE: loop exit
PB: predicated region body
PF: predicated region fallthrough
CT: control target
= control target key end

     0   :  { %vm49_vm0 = vcmask 1043456   ;;  %vm42_vm1 = vcmask 31744   ;;  %v1725_v8 = vmov 0   ;;  %s1845_s0 = inlined_call_operand.vmem [shape: f32[4,8], index: 0, kind: input, shape index: {}]   ;;  %s1846_s1 = inlined_call_operand.vmem [shape: f32[10,4], index: 1, kind: input, shape index: {}]   ;;  %s1847_s2 = inlined_call_operand.vmem [shape: f32[10,1], index: 2, kind: input, shape index: {}]   ;;  %s1848_s3 = inlined_call_operand.vmem [shape: f32[8,10], index: 3, kind: input, shape index: {}]   ;;  %s1849_s4 = inlined_call_operand.vmem [shape: f32[8,1], index: 4, kind: input, shape index: {}]   ;;  %s1850_s5 = inlined_call_operand.vmem [shape: f32[3,8], index: 5, kind: input, shape index: {}]   ;;  %s1851_s6 = inlined_call_operand.vmem [shape: f32[3,1], index: 6, kind: input, shape index: {}]   ;;  %s1852_s7 = inlined_call_operand.hbm [shape: f32[3,8], index: 7, kind: output, shape index: {}]  }
   0x1   :  { %v27_v0 = vld [vmem:[%s1845_s0] sm:$0xf]  ;;  %v29_v2 = vld [vmem:[%s1846_s1 + $0x8] sm:$0x3]  ;;  %1699 = vset.pattern.permute.xlu0 %v1725_v8  ;;  %1700 = vset.pattern.permute.xlu1 %v1725_v8 }
   0x2   :  { %v28_v1 = vld [vmem:[%s1846_s1] sm:$0xff]  ;;  %v51_v3 = vsel %vm49_vm0, %v27_v0, 0  ;;  %v31_v4 = vld [vmem:[%s1847_s2 + $0x8] sm:$0x3]  ;;  %v47_v7 = vsel %vm42_vm1, %v29_v2, 0 }
   0x3   :  { %v54_v5 = vand.u32 4294901760, %v51_v3  ;;  %v44_v6 = vsel %vm42_vm1, %v28_v1, 0 }
   0x4   :  { %12 = vsyncpa [#allocation3], 0  ;;  %v119_v9 = vand.u32 4294901760, %v44_v6  ;;  %v129_v10 = vand.u32 4294901760, %v47_v7  ;;  %39 = vperm.xlu0 %1699, %v31_v4   ;;  %v30_v12 = vld [vmem:[%s1847_s2] sm:$0xff]  ;;  %v1726_v24 = vmov 0.0|0.0  }
   0x5   :  { %1555 = vmatprep.subr.mxu0 %v54_v5  ;;  %1540 = vmatprep.subr.mxu1 %v54_v5  ;;  %v141_v11 = vsub.f32 %v51_v3, %v54_v5  ;;  %vm1727_vm2 = vmmov 0   ;;  %v1728_v25 = vmov 0.0   ;;  %v545_v26 = vld [vmem:[%s1849_s4] sm:$0xff]  ;;  %vm551_vm3 = vcmask 80896  }
   0x6   :  { %1556 = vmatpush3.msra.mxu0 %v54_v5  ;;  %v120_v13 = vsub.f32 %v44_v6, %v119_v9  ;;  %v130_v14 = vsub.f32 %v47_v7, %v129_v10  ;;  %1541 = vmatpush3.msra.mxu1 %v54_v5  ;;  %v1020_v27 = vld [vmem:[%s1851_s6] sm:$0x7]  ;;  %vm555_vm4 = vcmask 1041408   ;;  %vm1026_vm5 = vcmask 64512  }
   0x7   :  { %v142_v15 = vand.u32 4294901760, %v141_v11  ;;  %548 = vperm.xlu1 %1700, %v545_v26   ;;  %v544_v28 = vld [vmem:[%s1848_s3] sm:$0xff]  ;;  %vm1476_vm6 = vcmask 59392  }
   0x8   :  { %v121_v16 = vand.u32 4294901760, %v120_v13  ;;  %v131_v17 = vand.u32 4294901760, %v130_v14  ;;  %34 = vperm.xlu0 %1699, %v30_v12   ;;  %v553_v29 = vsel %vm551_vm3, %v544_v28, 0  ;;  %v1019_v62 = vld [vmem:[%s1850_s5] sm:$0x7]  ;;  %s1729_s5 = smov [#allocation2]  }
   0x9   :  { %1560 = vmatprep.subr.mxu0 %v142_v15  ;;  %v143_v18 = vsub.f32 %v141_v11, %v142_v15  ;;  %v626_v31 = vand.u32 4294901760, %v553_v29  ;;  %v1028_v63 = vsel %vm1026_vm5, %v1019_v62, 0  ;;  %s1484_s6 = sshll.u32 %s1729_s5, 4  ;;  %s1485_s6 = int_to_ptr.vmem [resolvable:$true] %s1484_s6 }
   0xa   :  { %1557 = vmatprep.mubr.f32.mxu0 %v121_v16  ;;  %v122_v19 = vsub.f32 %v120_v13, %v121_v16  ;;  %v132_v20 = vsub.f32 %v130_v14, %v131_v17  ;;  %v1096_v0 = vand.u32 4294901760, %v1028_v63  ;;  %s1701_s14 = scalar_lea.vmem %s1485_s6, 64  ;;  %p1706_p1 = scmp.lt.s32.totalorder %s1485_s6, %s1485_s6 }
   0xb   :  { %1558 = vmatmul.mubr.f32.vlgmr.msra.gmra.mrb[0].mxu0 %v131_v17  ;;  %v144_v21 = vand.u32 4294901760, %v143_v18  ;;  %1023 = vperm.xlu1 %1700, %v1020_v27   ;;  %v627_v34 = vsub.f32 %v553_v29, %v626_v31  ;;  %p1702_p0 = scmp.ne.s32.totalorder %s1485_s6, %s1701_s14  ;;  %p1707_p2 = scmp.lt.s32.totalorder %s1701_s14, %s1701_s14 }
   0xc   :  { %v123_v22 = vand.u32 4294901760, %v122_v19  ;;  %v133_v23 = vand.u32 4294901760, %v132_v20  ;;  %1561 = vmatpush3.msra.mxu0 %v142_v15  ;;  %1562 = vmatprep.mubr.f32.mxu0 %v119_v9  ;;  %v1097_v1 = vsub.f32 %v1028_v63, %v1096_v0 }
   0xd   :  { %1545 = vmatprep.subr.mxu1 %v144_v21  ;;  %1565 = vmatprep.subr.mxu0 %v54_v5  ;;  %v628_v41 = vand.u32 4294901760, %v627_v34  ;;  %p1708_p3 = por %p1707_p2, %p1706_p1 }
   0xe   :  { %1542 = vmatprep.mubr.f32.mxu1 %v123_v22  ;;  %v1098_v2 = vand.u32 4294901760, %v1097_v1 }
   0xf   :  { %1543 = vmatmul.mubr.f32.vlgmr.msra.gmra.mrb[0].mxu1 %v133_v23  ;;  %v629_v46 = vsub.f32 %v627_v34, %v628_v41  ;;  %p1709_p4 = pnand %p1708_p3, %p1702_p0 }
  0x10   :  { %1546 = vmatpush3.msra.mxu1 %v144_v21  ;;  %1547 = vmatprep.mubr.f32.mxu1 %v119_v9 }
  0x11   :  { %1550 = vmatprep.subr.mxu1 %v141_v11  ;;  %v630_v52 = vand.u32 4294901760, %v629_v46 }
  0x13   :  { %1563 = vmatmul.mubr.f32.vlgmr.msra.gmra.mrb[0].mxu0 %v129_v10 }
  0x14   :  { %1566 = vmatpush3.msra.mxu0 %v54_v5  ;;  %1567 = vmatprep.mubr.f32.mxu0 %v119_v9  ;;  %v1099_v5 = vsub.f32 %v1097_v1, %v1098_v2 }
  0x15   :  { %1612 = vmatprep.subr.mxu0 %v1728_v25 }
  0x16   :  { %v1100_v9 = vand.u32 4294901760, %v1099_v5 }
  0x17   :  { %1548 = vmatmul.mubr.f32.vlgmr.msra.gmra.mrb[0].mxu1 %v129_v10 }
  0x18   :  { %1551 = vmatpush3.msra.mxu1 %v141_v11  ;;  %1552 = vmatprep.mubr.f32.mxu1 %v120_v13 }
  0x19   :  { %1642 = vmatprep.subr.bf16.mxu1 %v1726_v24 }
  0x1b   :  { %1568 = vmatmul.mubr.f32.vlgmr.msra.gmra.mrb[0].mxu0 %v129_v10 }
  0x1c   :  { %1614 = vmatprep.mubr.msk.f32.mxu0 %vm1727_vm2, %v1728_v25 }
  0x1f   :  { %1553 = vmatmul.mubr.f32.vlgmr.msra.gmra.mrb[0].mxu1 %v130_v14 }
  0x20   :  { %1574 = vmatprep.mubr.msk.f32.mxu1 %vm1727_vm2, %v1728_v25 }
  0x83   :  { %v40_v30 = vpop.permute.xlu0 %39 }
  0x86   :  { %v549_v3 = vpop.permute.xlu1 %548 }
  0x87   :  { %v35_v36 = vpop.permute.xlu0 %34 }
  0x8a   :  { %v1024_v15 = vpop.permute.xlu1 %1023 }
  0xee   :  { %v1569_v32 = vpop.f32.mrb[0].mxu0 }
  0xef   :  { %v532_v33 = vpop.f32.mrb[1].mxu0 }
  0xf2   :  { %v1554_v35 = vpop.f32.mrb[0].mxu1 }
  0xf3   :  { %v1660_v37 = vadd.f32 %v1554_v35, %v40_v30  ;;  %v291_v38 = vpop.f32.mrb[1].mxu1 }
  0xf4   :  { %v1662_v39 = vadd.f32 %v291_v38, %v35_v36 }
  0xf5   :  { %v1661_v40 = vadd.f32 %v1660_v37, %v1569_v32 }
  0xf6   :  { %v1663_v42 = vadd.f32 %v1662_v39, %v532_v33 }
  0xf7   :  { %v543_v43 = vmax.f32 %v1661_v40, 0.0 }
  0xf8   :  { %v542_v44 = vmax.f32 %v1663_v42, 0.0 }
  0xf9   :  { %v557_v45 = vsel %vm555_vm4, %v543_v43, 0 }
  0xfa   :  { %v563_v47 = vand.u32 4294901760, %v557_v45  ;;  %v560_v48 = vand.u32 4294901760, %v542_v44 }
  0xfc   :  { %v645_v49 = vsub.f32 %v557_v45, %v563_v47  ;;  %v1643_v50 = vpack.c.bf16 %v563_v47, %v560_v48  ;;  %v638_v51 = vsub.f32 %v542_v44, %v560_v48 }
  0xfe   :  { %v646_v53 = vand.u32 4294901760, %v645_v49  ;;  %v639_v54 = vand.u32 4294901760, %v638_v51  ;;  %1644 = vmatpush3.bf16.msra.mxu1 %v1643_v50  ;;  %v1649_v55 = vpack.c.bf16 %v645_v49, %v638_v51 }
  0xff   :  { %1645 = vmatprep.subr.bf16.mxu1 %v1726_v24 }
 0x100   :  { %v640_v56 = vsub.f32 %v638_v51, %v639_v54  ;;  %v647_v57 = vsub.f32 %v645_v49, %v646_v53  ;;  %v1655_v58 = vpack.c.bf16 %v646_v53, %v639_v54 }
 0x101   :  { %1575 = vmatmul.mubr.f32.vlgmr.msra.gmra.mrb[2].mxu1 %v630_v52 }
 0x102   :  { %v641_v59 = vand.u32 4294901760, %v640_v56  ;;  %v648_v60 = vand.u32 4294901760, %v647_v57  ;;  %1581 = vmatprep.mubr.msk.f32.mxu1 %vm1727_vm2, %v1728_v25 }
 0x104   :  { %v1646_v61 = vpack.c.bf16 %v648_v60, %v641_v59 }
 0x106   :  { %1647 = vmatpush3.bf16.msra.mxu1 %v1646_v61 }
 0x107   :  { %1648 = vmatprep.subr.bf16.mxu1 %v1726_v24 }
 0x109   :  { %1582 = vmatmul.mubr.f32.vlgmr.msra.gmra.mrb[2].mxu1 %v626_v31 }
 0x10a   :  { %1650 = vmatpush3.bf16.msra.mxu1 %v1649_v55  ;;  %1588 = vmatprep.mubr.msk.f32.mxu1 %vm1727_vm2, %v1728_v25 }
 0x10b   :  { %1651 = vmatprep.subr.bf16.mxu1 %v1726_v24 }
 0x111   :  { %1589 = vmatmul.mubr.f32.vlgmr.msra.gmra.mrb[2].mxu1 %v627_v34 }
 0x112   :  { %1653 = vmatpush3.bf16.msra.mxu1 %v1643_v50  ;;  %1595 = vmatprep.mubr.msk.f32.mxu1 %vm1727_vm2, %v1728_v25 }
 0x113   :  { %1654 = vmatprep.subr.bf16.mxu1 %v1726_v24 }
 0x119   :  { %1596 = vmatmul.mubr.f32.vlgmr.msra.gmra.mrb[2].mxu1 %v628_v41 }
 0x11a   :  { %1656 = vmatpush3.bf16.msra.mxu1 %v1655_v58  ;;  %1602 = vmatprep.mubr.msk.f32.mxu1 %vm1727_vm2, %v1728_v25 }
 0x11b   :  { %1657 = vmatprep.subr.bf16.mxu1 %v1726_v24 }
 0x121   :  { %1603 = vmatmul.mubr.f32.vlgmr.msra.gmra.mrb[2].mxu1 %v626_v31 }
 0x122   :  { %1659 = vmatpush3.bf16.msra.mxu1 %v1643_v50  ;;  %1609 = vmatprep.mubr.msk.f32.mxu1 %vm1727_vm2, %v1728_v25 }
 0x129   :  { %1610 = vmatmul.mubr.f32.vlgmr.msra.gmra.mrb[2].mxu1 %v626_v31 }
 0x1fc   :  { %v1014_v4 = vpop.f32.mrb[2].mxu1 }
 0x1fd   :  { %v1664_v6 = vadd.f32 %v1014_v4, %v549_v3  ;;  %v1611_v7 = vpop.f32.mrb[3].mxu1 }
 0x1ff   :  { %v1018_v8 = vmax.f32 %v1664_v6, 0.0 }
 0x201   :  { %v1031_v10 = vand.u32 4294901760, %v1018_v8 }
 0x203   :  { %v1108_v11 = vsub.f32 %v1018_v8, %v1031_v10  ;;  %1613 = vmatpush3.msra.mxu0 %v1031_v10 }
 0x204   :  { %1615 = vmatmul.mubr.f32.vlgmr.msra.gmra.mrb[2].mxu0 %v1100_v9  ;;  %1617 = vmatprep.subr.mxu0 %v1728_v25 }
 0x205   :  { %v1109_v12 = vand.u32 4294901760, %v1108_v11  ;;  %1619 = vmatprep.mubr.msk.f32.mxu0 %vm1727_vm2, %v1728_v25 }
 0x207   :  { %v1110_v13 = vsub.f32 %v1108_v11, %v1109_v12 }
 0x209   :  { %v1111_v14 = vand.u32 4294901760, %v1110_v13 }
 0x20b   :  { %1618 = vmatpush3.msra.mxu0 %v1111_v14 }
 0x20c   :  { %1620 = vmatmul.mubr.f32.vlgmr.msra.gmra.mrb[2].mxu0 %v1096_v0  ;;  %1622 = vmatprep.subr.mxu0 %v1728_v25 }
 0x20d   :  { %1623 = vmatpush3.msra.mxu0 %v1108_v11  ;;  %1624 = vmatprep.mubr.msk.f32.mxu0 %vm1727_vm2, %v1728_v25 }
 0x20e   :  { %1627 = vmatprep.subr.mxu0 %v1728_v25 }
 0x214   :  { %1625 = vmatmul.mubr.f32.vlgmr.msra.gmra.mrb[2].mxu0 %v1097_v1 }
 0x215   :  { %1628 = vmatpush3.msra.mxu0 %v1031_v10  ;;  %1629 = vmatprep.mubr.msk.f32.mxu0 %vm1727_vm2, %v1728_v25 }
 0x216   :  { %1632 = vmatprep.subr.mxu0 %v1728_v25 }
 0x21c   :  { %1630 = vmatmul.mubr.f32.vlgmr.msra.gmra.mrb[2].mxu0 %v1098_v2 }
 0x21d   :  { %1633 = vmatpush3.msra.mxu0 %v1109_v12  ;;  %1634 = vmatprep.mubr.msk.f32.mxu0 %vm1727_vm2, %v1728_v25 }
 0x21e   :  { %1637 = vmatprep.subr.mxu0 %v1728_v25 }
 0x224   :  { %1635 = vmatmul.mubr.f32.vlgmr.msra.gmra.mrb[2].mxu0 %v1096_v0 }
 0x225   :  { %1638 = vmatpush3.msra.mxu0 %v1031_v10  ;;  %1639 = vmatprep.mubr.msk.f32.mxu0 %vm1727_vm2, %v1728_v25 }
 0x22c   :  { %1640 = vmatmul.mubr.f32.vlgmr.msra.gmra.mrb[2].mxu0 %v1096_v0 }
 0x2ff   :  { %v1472_v16 = vpop.f32.mrb[2].mxu0 }
 0x300   :  { %v1665_v17 = vadd.f32 %v1472_v16, %v1024_v15  ;;  %v1641_v18 = vpop.f32.mrb[3].mxu0 }
 0x302   :  { %1477 = vst.msk [vmem:[#allocation2] sm:$0x7] %vm1476_vm6, %v1665_v17 }
 0x303   :  { %1712 = shalt.err (!%p1709_p4)
}
 0x304   :  { %s1713_s17 = scalar_lea.hbm %s1852_s7, 64 }
 0x305   :  { %p1714_p5 = scmp.ne.s32.totalorder %s1852_s7, %s1713_s17  ;;  %p1717_p6 = scmp.lt.u32.totalorder %s1713_s17, %s1852_s7 }
 0x307   :  { %p1719_p7 = pnand %p1717_p6, %p1714_p5 }
 0x309   :  { %1722 = shalt.err (!%p1719_p7)
}
 0x30a   :  { %1487 = dma.vmem_to_hbm [thread:$0]  %s1485_s6, 64, %s1852_s7, [#allocation3]  }
 0x30b   :  { %1723 = dma.done.wait [#allocation3], 64  }
 0x30c   :  { %1724 = vsyncadd [#allocation3], 4294967232 }
 0x30d   :  { %1491 = vsyncpa [#allocation3], 1 }

</bundles_post_ra>
